<compile_context>
chip_gen: v7x
topology: tpu7x:2x2x1
jax: 0.10.0
libtpu: 0.0.40
codegen_flags: <defaults>
</compile_context>

<pallas_src>
import itertools

import jax
import jax.numpy as jnp
from jax.experimental import pallas as pl
from jax.experimental.pallas import tpu as pltpu


def _merge_kernel(x_ref, w_ref, b_ref, o_ref):
    # x_ref: (TM, 8c)   w_ref: (8c, 2c) = diag(gamma) @ W   b_ref: (1, 2c) = beta @ W
    # o_ref: (TM, 2c)
    x = x_ref[...].astype(jnp.float32)
    c8 = x.shape[-1]
    inv_c8 = 1.0 / float(c8)
    # one-pass statistics (independent reductions; var = E[x^2] - mean^2)
    s1 = jnp.sum(x, axis=-1, keepdims=True)
    s2 = jnp.sum(x * x, axis=-1, keepdims=True)
    mean = s1 * inv_c8
    var = s2 * inv_c8 - mean * mean
    xn = (x - mean) * jax.lax.rsqrt(var + 1e-5)  # torch.nn.LayerNorm default eps
    # matmul in the weight's native dtype (bf16 stays bf16), f32 accumulation
    acc = jnp.dot(xn.astype(w_ref.dtype), w_ref[...],
                  preferred_element_type=jnp.float32)
    o_ref[...] = (acc + b_ref[...].astype(jnp.float32)).astype(o_ref.dtype)


def _vmem_budget():
    """Returns (vmem_limit_bytes or None, budget used for tile sizing)."""
    try:
        cap = int(pltpu.get_tpu_info().vmem_capacity_bytes)
        limit = max(min(cap * 3 // 4, 96 * 1024 * 1024), 16 * 1024 * 1024)
        return limit, limit
    except Exception:
        # unknown generation: do not force a limit, size tiles conservatively
        return None, 16 * 1024 * 1024


def _pick_tm(n_rows, c8, c2, x_dtype, w_dtype, out_dtype, budget_bytes):
    """Largest row tile (<=1024, multiple of 8) whose double-buffered blocks fit."""
    row_bytes = (2 * c8 * jnp.dtype(x_dtype).itemsize
                 + 2 * c2 * jnp.dtype(out_dtype).itemsize)
    fixed_bytes = 2 * c8 * c2 * jnp.dtype(w_dtype).itemsize + 4 * c2 + (2 << 20)
    avail = max(budget_bytes - fixed_bytes, 64 * row_bytes)
    tm = int(avail // row_bytes)
    tm = max(64, min(tm, 1024))
    tm -= tm % 8
    if n_rows <= tm:
        # single grid step; a full-extent (non multiple-of-8) block is legal
        return max(int(n_rows), 1)
    return tm


def _norm_reduce_pallas(x2d, w_fold, bias_fold):
    """x2d: (N, 8c) -> (N, 2c).  LayerNorm(8c) (affine folded) then @ w_fold."""
    n, c8 = x2d.shape
    c2 = w_fold.shape[1]
    vmem_limit, budget = _vmem_budget()
    tm = _pick_tm(n, c8, c2, x2d.dtype, w_fold.dtype, x2d.dtype, budget)
    grid = (pl.cdiv(n, tm),)

    cp_kwargs = dict(
        dimension_semantics=("parallel",),
        # allow XLA to fuse the 2x2x2-gather transpose into the input DMA
        allow_input_fusion=[True, False, False],
    )
    if vmem_limit is not None:
        cp_kwargs["vmem_limit_bytes"] = int(vmem_limit)

    return pl.pallas_call(
        _merge_kernel,
        out_shape=jax.ShapeDtypeStruct((n, c2), x2d.dtype),
        grid_spec=pltpu.PrefetchScalarGridSpec(
            num_scalar_prefetch=0,
            grid=grid,
            in_specs=[
                pl.BlockSpec((tm, c8), lambda i: (i, 0)),
                pl.BlockSpec((c8, c2), lambda i: (0, 0)),
                pl.BlockSpec((1, c2), lambda i: (0, 0)),
            ],
            out_specs=pl.BlockSpec((tm, c2), lambda i: (i, 0)),
        ),
        compiler_params=pltpu.CompilerParams(**cp_kwargs),
    )(x2d, w_fold, bias_fold)


def patch_merging_v2_3d(x, gamma, beta, w_t):
    """Forward pass of PatchMergingV2 (spatial_dims=3) for x: (b, d, h, w, c)."""
    b, d, h, w, c = x.shape
    # pad odd spatial dims; same semantics as F.pad(x, (0,0, 0,w%2, 0,h%2, 0,d%2))
    if (d % 2) or (h % 2) or (w % 2):
        x = jnp.pad(x, ((0, 0), (0, d % 2), (0, h % 2), (0, w % 2), (0, 0)))
        b, d, h, w, c = x.shape
    d2, h2, w2 = d // 2, h // 2, w // 2

    # 2x2x2 neighbor gather as a single transpose; channel order matches
    # torch.cat([x[:, i::2, j::2, k::2, :] for i,j,k in product(range(2),...)], -1)
    x8 = x.reshape(b, d2, 2, h2, 2, w2, 2, c)
    x8 = jnp.transpose(x8, (0, 1, 3, 5, 2, 4, 6, 7))       # (b,d2,h2,w2,i,j,k,c)
    x2d = x8.reshape(b * d2 * h2 * w2, 8 * c)               # (N, 8c)

    # Fold LayerNorm affine into the reduction weight (done once, tiny):
    #   (xn*g + b) @ W == xn @ (g[:,None]*W) + (b @ W)
    gf = gamma.astype(jnp.float32)
    bf = beta.astype(jnp.float32)
    wf = w_t.astype(jnp.float32)
    w_fold = (gf[:, None] * wf).astype(w_t.dtype)           # (8c, 2c)
    bias_fold = (bf @ wf).reshape(1, -1).astype(jnp.float32)  # (1, 2c)

    y2d = _norm_reduce_pallas(x2d, w_fold, bias_fold)
    return y2d.reshape(b, d2, h2, w2, w_t.shape[1])


if __name__ == "__main__":
    # dim=64 -> 2c=128: lane-dense output store (the realistic Swin/DaViT case).
    dim = 64
    b, d, h, w = 2, 4, 5, 6          # h is odd -> exercises the padding path
    key = jax.random.PRNGKey(0)
    kx, kg, kb, kw = jax.random.split(key, 4)

    x = jax.random.normal(kx, (b, d, h, w, dim), dtype=jnp.float32)
    # LayerNorm(8*dim) params and Linear(8*dim, 2*dim, bias=False) weight (W^T)
    gamma = 1.0 + 0.1 * jax.random.normal(kg, (8 * dim,), dtype=jnp.float32)
    beta = 0.1 * jax.random.normal(kb, (8 * dim,), dtype=jnp.float32)
    w_t = 0.05 * jax.random.normal(kw, (8 * dim, 2 * dim), dtype=jnp.float32)

    out = jax.jit(patch_merging_v2_3d)(x, gamma, beta, w_t)
    out = jax.block_until_ready(out)

    # pure-JAX reference: direct transliteration of the PyTorch forward
    xp = jnp.pad(x, ((0, 0), (0, d % 2), (0, h % 2), (0, w % 2), (0, 0)))
    parts = [
        xp[:, i::2, j::2, k::2, :]
        for i, j, k in itertools.product(range(2), range(2), range(2))
    ]
    xm = jnp.concatenate(parts, axis=-1)
    mean = jnp.mean(xm, axis=-1, keepdims=True)
    var = jnp.mean((xm - mean) ** 2, axis=-1, keepdims=True)
    ref = ((xm - mean) / jnp.sqrt(var + 1e-5)) * gamma + beta
    ref = ref @ w_t

    out_shape = (b, (d + d % 2) // 2, (h + h % 2) // 2, (w + w % 2) // 2, 2 * dim)
    assert out.shape == out_shape, (out.shape, out_shape)
    max_err = float(jnp.max(jnp.abs(out - ref)))
    assert jnp.allclose(out, ref, atol=5e-4, rtol=5e-4), f"max abs err {max_err}"

    print("KERNEL_OK")
</pallas_src>

<mosaic_0001>
module attributes {stable_mosaic.version = 11 : i64} {
  func.func @_merge_kernel(%arg0: i32, %arg1: memref<36x512xf32, #tpu.memory_space<vmem>>, %arg2: memref<512x128xf32, #tpu.memory_space<vmem>>, %arg3: memref<1x128xf32, #tpu.memory_space<vmem>>, %arg4: memref<36x128xf32, #tpu.memory_space<vmem>>) attributes {dimension_semantics = [#tpu.dimension_semantics<parallel>], iteration_bounds = array<i64: 1>, scalar_prefetch = 0 : i64, scratch_operands = 0 : i64, tpu.core_type = #tpu.core_type<tc>, window_params = [{transform_indices = @transform_0, window_bounds = array<i64: 36, 512>}, {pipeline_mode = #tpu.pipeline_mode<synchronous>, transform_indices = @transform_1, window_bounds = array<i64: 512, 128>}, {pipeline_mode = #tpu.pipeline_mode<synchronous>, transform_indices = @transform_2, window_bounds = array<i64: 1, 128>}, {transform_indices = @transform_3, window_bounds = array<i64: 36, 128>}]} {
    %c0 = arith.constant 0 : index
    %c0_0 = arith.constant 0 : index
    %0 = vector.load %arg1[%c0, %c0_0] : memref<36x512xf32, #tpu.memory_space<vmem>>, vector<36x512xf32>
    %cst = arith.constant dense<0.000000e+00> : vector<36xf32>
    %1 = vector.multi_reduction <add>, %0, %cst [1] : vector<36x512xf32> to vector<36xf32>
    %2 = vector.shape_cast %1 : vector<36xf32> to vector<36x1xf32>
    %3 = arith.mulf %0, %0 : vector<36x512xf32>
    %cst_1 = arith.constant dense<0.000000e+00> : vector<36xf32>
    %4 = vector.multi_reduction <add>, %3, %cst_1 [1] : vector<36x512xf32> to vector<36xf32>
    %5 = vector.shape_cast %4 : vector<36xf32> to vector<36x1xf32>
    %cst_2 = arith.constant 0.001953125 : f32
    %6 = vector.broadcast %cst_2 : f32 to vector<36x1xf32>
    %7 = arith.mulf %2, %6 : vector<36x1xf32>
    %cst_3 = arith.constant 0.001953125 : f32
    %8 = vector.broadcast %cst_3 : f32 to vector<36x1xf32>
    %9 = arith.mulf %5, %8 : vector<36x1xf32>
    %10 = arith.mulf %7, %7 : vector<36x1xf32>
    %11 = arith.subf %9, %10 : vector<36x1xf32>
    %12 = vector.broadcast %7 : vector<36x1xf32> to vector<36x512xf32>
    %13 = arith.subf %0, %12 : vector<36x512xf32>
    %cst_4 = arith.constant 9.99999974E-6 : f32
    %14 = vector.broadcast %cst_4 : f32 to vector<36x1xf32>
    %15 = arith.addf %11, %14 : vector<36x1xf32>
    %16 = math.rsqrt %15 : vector<36x1xf32>
    %17 = vector.broadcast %16 : vector<36x1xf32> to vector<36x512xf32>
    %18 = arith.mulf %13, %17 : vector<36x512xf32>
    %c0_5 = arith.constant 0 : index
    %c0_6 = arith.constant 0 : index
    %19 = vector.load %arg2[%c0_5, %c0_6] : memref<512x128xf32, #tpu.memory_space<vmem>>, vector<512x128xf32>
    %cst_7 = arith.constant dense<0.000000e+00> : vector<36x128xf32>
    %20 = tpu.matmul %18, %19, %cst_7 {dimension_numbers = #tpu.dot_dimension_numbers<[1], [0], [0], [1], [0, 0, 1, 1], [], []>} : vector<36x512xf32>, vector<512x128xf32>, vector<36x128xf32> -> vector<36x128xf32>
    %c0_8 = arith.constant 0 : index
    %c0_9 = arith.constant 0 : index
    %21 = vector.load %arg3[%c0_8, %c0_9] : memref<1x128xf32, #tpu.memory_space<vmem>>, vector<1x128xf32>
    %22 = vector.broadcast %21 : vector<1x128xf32> to vector<36x128xf32>
    %23 = arith.addf %20, %22 : vector<36x128xf32>
    %c0_10 = arith.constant 0 : index
    %c0_11 = arith.constant 0 : index
    %24 = vector.load %arg4[%c0_10, %c0_11] : memref<36x128xf32, #tpu.memory_space<vmem>>, vector<36x128xf32>
    tpu.vector_store %arg4[%c0_10, %c0_11], %23 {strides = array<i32>} : memref<36x128xf32, #tpu.memory_space<vmem>>, vector<36x128xf32>,
    return
  }
  func.func @transform_0(%arg0: i32) -> (i32, i32) {
    %c0_i32 = arith.constant 0 : i32
    %c0_i32_0 = arith.constant 0 : i32
    return %arg0, %c0_i32 : i32, i32
  }
  func.func @transform_1(%arg0: i32) -> (i32, i32) {
    %c0_i32 = arith.constant 0 : i32
    %c0_i32_0 = arith.constant 0 : i32
    %c0_i32_1 = arith.constant 0 : i32
    return %c0_i32, %c0_i32_0 : i32, i32
  }
  func.func @transform_2(%arg0: i32) -> (i32, i32) {
    %c0_i32 = arith.constant 0 : i32
    %c0_i32_0 = arith.constant 0 : i32
    %c0_i32_1 = arith.constant 0 : i32
    return %c0_i32, %c0_i32_0 : i32, i32
  }
  func.func @transform_3(%arg0: i32) -> (i32, i32) {
    %c0_i32 = arith.constant 0 : i32
    %c0_i32_0 = arith.constant 0 : i32
    return %arg0, %c0_i32 : i32, i32
  }
}

</mosaic_0001>

<bundles_post_ra>
// kernel: patch_merging_v2_3d.1
= control target key start
LH: loop header
LB: loop body
LE: loop exit
PB: predicated region body
PF: predicated region fallthrough
CT: control target
= control target key end

     0   :  { %vm54_vm0 = vcmask 1043456   ;;  %s1062_s0 = inlined_call_operand.vmem [shape: f32[36,512], index: 0, kind: input, shape index: {}]   ;;  %s1063_s1 = inlined_call_operand.vmem [shape: f32[512,128], index: 1, kind: input, shape index: {}]   ;;  %s1064_s2 = inlined_call_operand.vmem [shape: f32[1,128], index: 2, kind: input, shape index: {}]   ;;  %s1065_s3 = inlined_call_operand.vmem [shape: f32[36,128], index: 3, kind: output, shape index: {}]  }
   0x1   :  { %v635_v0 = vld [vmem:[%s1062_s0 + $0x20] sm:$0xff]  ;;  %v640_v1 = vld [vmem:[%s1062_s0 + $0x28] sm:$0xff]  ;;  %v645_v2 = vld [vmem:[%s1062_s0 + $0x30] sm:$0xff] }
   0x2   :  { %v650_v3 = vld [vmem:[%s1062_s0 + $0x38] sm:$0xff]  ;;  %v39_v4 = vadd.f32 %v640_v1, %v635_v0  ;;  %v657_v5 = vld [vmem:[%s1062_s0] sm:$0xff]  ;;  %v662_v6 = vld [vmem:[%s1062_s0 + $0x8] sm:$0xff]  ;;  %v68_v7 = vmul.f32 %v635_v0, %v635_v0  ;;  %v69_v8 = vmul.f32 %v640_v1, %v640_v1  ;;  %v70_v9 = vmul.f32 %v645_v2, %v645_v2 }
   0x3   :  { %v673_v10 = vld [vmem:[%s1062_s0 + $0x10] sm:$0xff]  ;;  %v678_v11 = vld [vmem:[%s1062_s0 + $0x18] sm:$0xff]  ;;  %v34_v12 = vadd.f32 %v662_v6, %v657_v5  ;;  %v71_v13 = vmul.f32 %v650_v3, %v650_v3  ;;  %v64_v14 = vmul.f32 %v657_v5, %v657_v5  ;;  %v65_v15 = vmul.f32 %v662_v6, %v662_v6  ;;  %v691_v16 = vld [vmem:[%s1062_s0 + $0x40] sm:$0xff] }
   0x4   :  { %v40_v17 = vadd.f32 %v39_v4, %v645_v2  ;;  %v89_v18 = vadd.f32 %v69_v8, %v68_v7  ;;  %v66_v19 = vmul.f32 %v673_v10, %v673_v10  ;;  %v67_v20 = vmul.f32 %v678_v11, %v678_v11  ;;  %v701_v21 = vld [vmem:[%s1062_s0 + $0x48] sm:$0xff]  ;;  %v706_v22 = vld [vmem:[%s1062_s0 + $0x50] sm:$0xff]  ;;  %v711_v23 = vld [vmem:[%s1062_s0 + $0x58] sm:$0xff] }
   0x5   :  { %v35_v24 = vadd.f32 %v34_v12, %v673_v10  ;;  %v84_v25 = vadd.f32 %v65_v15, %v64_v14  ;;  %v44_v26 = vadd.f32 %v701_v21, %v691_v16  ;;  %v72_v27 = vmul.f32 %v691_v16, %v691_v16  ;;  %v721_v28 = vld [vmem:[%s1062_s0 + $0x60] sm:$0xff]  ;;  %v726_v29 = vld [vmem:[%s1062_s0 + $0x68] sm:$0xff]  ;;  %v736_v34 = vld [vmem:[%s1062_s0 + $0x70] sm:$0xff] }
   0x6   :  { %v41_v30 = vadd.f32 %v40_v17, %v650_v3  ;;  %v90_v31 = vadd.f32 %v89_v18, %v70_v9  ;;  %v73_v32 = vmul.f32 %v701_v21, %v701_v21  ;;  %v74_v33 = vmul.f32 %v706_v22, %v706_v22  ;;  %v745_v39 = vld [vmem:[%s1062_s0 + $0x80] sm:$0xf]  ;;  %v750_v42 = vld [vmem:[%s1062_s0 + $0x78] sm:$0xff]  ;;  %v759_v45 = vld [vmem:[%s1062_s0 + $0x88] sm:$0xf] }
   0x7   :  { %v36_v35 = vadd.f32 %v35_v24, %v678_v11  ;;  %v85_v36 = vadd.f32 %v84_v25, %v66_v19  ;;  %v45_v37 = vadd.f32 %v44_v26, %v706_v22  ;;  %v75_v38 = vmul.f32 %v711_v23, %v711_v23  ;;  %v768_v49 = vld [vmem:[%s1062_s0 + $0x90] sm:$0xf]  ;;  %v774_v52 = vld [vmem:[%s1062_s0 + $0x98] sm:$0xf]  ;;  %v199_v54 = vld [vmem:[%s1063_s1 + $0x80] sm:$0xff] }
   0x8   :  { %42 = vadd.xlane.f32.xlu1 %v41_v30  ;;  %v91_v40 = vadd.f32 %v90_v31, %v71_v13  ;;  %v94_v41 = vadd.f32 %v73_v32, %v72_v27  ;;  %v49_v43 = vadd.f32 %v726_v29, %v721_v28  ;;  %v76_v44 = vmul.f32 %v721_v28, %v721_v28  ;;  %v200_v59 = vld [vmem:[%s1063_s1 + $0x88] sm:$0xff]  ;;  %v231_v60 = vld [vmem:[%s1063_s1 + $0x180] sm:$0xff]  ;;  %v201_v19 = vld [vmem:[%s1063_s1 + $0x90] sm:$0xff] }
   0x9   :  { %37 = vadd.xlane.f32.xlu0 %v36_v35  ;;  %v86_v46 = vadd.f32 %v85_v36, %v67_v20  ;;  %v77_v47 = vmul.f32 %v726_v29, %v726_v29  ;;  %v78_v48 = vmul.f32 %v736_v34, %v736_v34  ;;  %v46_v50 = vadd.f32 %v45_v37, %v711_v23  ;;  %v232_v61 = vld [vmem:[%s1063_s1 + $0x188] sm:$0xff]  ;;  %v183_v8 = vld [vmem:[%s1063_s1] sm:$0xff]  ;;  %v202_v26 = vld [vmem:[%s1063_s1 + $0x98] sm:$0xff] }
   0xa   :  { %v95_v51 = vadd.f32 %v94_v41, %v74_v33  ;;  %v55_v53 = vsel %vm54_vm0, %v745_v39, 0.0  ;;  %v50_v55 = vadd.f32 %v49_v43, %v736_v34  ;;  %v79_v56 = vmul.f32 %v750_v42, %v750_v42  ;;  %v184_v9 = vld [vmem:[%s1063_s1 + $0x8] sm:$0xff]  ;;  %v215_v17 = vld [vmem:[%s1063_s1 + $0x100] sm:$0xff]  ;;  %v233_v27 = vld [vmem:[%s1063_s1 + $0x190] sm:$0xff] }
   0xb   :  { %v99_v57 = vadd.f32 %v77_v47, %v76_v44  ;;  %v56_v58 = vsel %vm54_vm0, %v759_v45, 0.0  ;;  %v58_v4 = vsel %vm54_vm0, %v768_v49, 0.0  ;;  %v80_v7 = vmul.f32 %v745_v39, %v745_v39  ;;  %v216_v18 = vld [vmem:[%s1063_s1 + $0x108] sm:$0xff]  ;;  %v234_v30 = vld [vmem:[%s1063_s1 + $0x198] sm:$0xff]  ;;  %v185_v36 = vld [vmem:[%s1063_s1 + $0x10] sm:$0xff] }
   0xc   :  { %92 = vadd.xlane.f32.xlu1 %v91_v40  ;;  %v96_v62 = vadd.f32 %v95_v51, %v75_v38  ;;  %v57_v63 = vadd.f32 %v56_v58, %v55_v53  ;;  %v81_v13 = vmul.f32 %v759_v45, %v759_v45  ;;  %v82_v14 = vmul.f32 %v768_v49, %v768_v49  ;;  %v186_v37 = vld [vmem:[%s1063_s1 + $0x18] sm:$0xff]  ;;  %v217_v43 = vld [vmem:[%s1063_s1 + $0x110] sm:$0xff]  ;;  %v204_v58 = vld [vmem:[%s1063_s1 + $0xa8] sm:$0xff] }
   0xd   :  { %87 = vadd.xlane.f32.xlu0 %v86_v46  ;;  %v100_v12 = vadd.f32 %v99_v57, %v78_v48  ;;  %v83_v15 = vmul.f32 %v774_v52, %v774_v52  ;;  %v104_v20 = vsel %vm54_vm0, %v80_v7, 0.0  ;;  %v538_v24 = vpack.c.bf16 %v200_v59, %v199_v54  ;;  %v218_v44 = vld [vmem:[%s1063_s1 + $0x118] sm:$0xff]  ;;  %v235_v59 = vld [vmem:[%s1063_s1 + $0x1a0] sm:$0xff] }
   0xe   :  { %v570_v25 = vpack.c.bf16 %v232_v61, %v231_v60  ;;  %v51_v31 = vadd.f32 %v50_v55, %v750_v42  ;;  %v59_v32 = vadd.f32 %v58_v4, %v57_v63  ;;  %v105_v33 = vsel %vm54_vm0, %v81_v13, 0.0  ;;  %v187_v63 = vld [vmem:[%s1063_s1 + $0x20] sm:$0xff]  ;;  %v188_v4 = vld [vmem:[%s1063_s1 + $0x28] sm:$0xff] }
   0xf   :  { %v107_v35 = vsel %vm54_vm0, %v82_v14, 0.0  ;;  %v101_v38 = vadd.f32 %v100_v12, %v79_v56  ;;  %v106_v40 = vadd.f32 %v105_v33, %v104_v20  ;;  %539 = vmatprep.subr.bf16.mxu0 %v538_v24  ;;  %v540_v41 = vpack.c.bf16 %v184_v9, %v183_v8  ;;  %v219_v9 = vld [vmem:[%s1063_s1 + $0x120] sm:$0xff]  ;;  %v220_v12 = vld [vmem:[%s1063_s1 + $0x128] sm:$0xff]  ;;  %v205_v14 = vld [vmem:[%s1063_s1 + $0xb0] sm:$0xff] }
  0x10   :  { %97 = vadd.xlane.f32.xlu1 %v96_v62  ;;  %v109_v46 = vsel %vm54_vm0, %v83_v15, 0.0  ;;  %571 = vmatprep.subr.bf16.mxu1 %v570_v25  ;;  %v572_v47 = vpack.c.bf16 %v216_v18, %v215_v17  ;;  %v542_v48 = vpack.c.bf16 %v202_v26, %v201_v19  ;;  %v574_v51 = vpack.c.bf16 %v234_v30, %v233_v27  ;;  %v236_v62 = vld [vmem:[%s1063_s1 + $0x1a8] sm:$0xff]  ;;  %v206_v15 = vld [vmem:[%s1063_s1 + $0xb8] sm:$0xff]  ;;  %v237_v17 = vld [vmem:[%s1063_s1 + $0x1b0] sm:$0xff] }
  0x11   :  { %47 = vadd.xlane.f32.xlu0 %v46_v50  ;;  %v60_v53 = vsel %vm54_vm0, %v774_v52, 0.0  ;;  %v108_v54 = vadd.f32 %v107_v35, %v106_v40  ;;  %541 = vmatpush3.bf16.msra.mxu0 %v540_v41  ;;  %v544_v55 = vpack.c.bf16 %v186_v37, %v185_v36  ;;  %v576_v56 = vpack.c.bf16 %v218_v44, %v217_v43  ;;  %v203_v50 = vld [vmem:[%s1063_s1 + $0xa0] sm:$0xff]  ;;  %v238_v19 = vld [vmem:[%s1063_s1 + $0x1b8] sm:$0xff]  ;;  %v189_v20 = vld [vmem:[%s1063_s1 + $0x30] sm:$0xff] }
  0x12   :  { %573 = vmatpush3.bf16.msra.mxu1 %v572_v47  ;;  %543 = vmatprep.subr.bf16.mxu0 %v542_v48  ;;  %v61_v60 = vadd.f32 %v60_v53, %v59_v32  ;;  %v546_v61 = vpack.c.bf16 %v204_v58, %v203_v50  ;;  %v578_v7 = vpack.c.bf16 %v236_v62, %v235_v59  ;;  %v190_v24 = vld [vmem:[%s1063_s1 + $0x38] sm:$0xff]  ;;  %v221_v27 = vld [vmem:[%s1063_s1 + $0x130] sm:$0xff]  ;;  %v207_v32 = vld [vmem:[%s1063_s1 + $0xc0] sm:$0xff] }
  0x13   :  { %v110_v57 = vadd.f32 %v109_v46, %v108_v54  ;;  %575 = vmatprep.subr.bf16.mxu1 %v574_v51  ;;  %v548_v8 = vpack.c.bf16 %v188_v4, %v187_v63  ;;  %v580_v13 = vpack.c.bf16 %v220_v12, %v219_v9  ;;  %v550_v18 = vpack.c.bf16 %v206_v15, %v205_v14  ;;  %v222_v30 = vld [vmem:[%s1063_s1 + $0x138] sm:$0xff]  ;;  %v208_v33 = vld [vmem:[%s1063_s1 + $0xc8] sm:$0xff]  ;;  %v239_v35 = vld [vmem:[%s1063_s1 + $0x1c0] sm:$0xff] }
  0x14   :  { %102 = vadd.xlane.f32.xlu1 %v101_v38  ;;  %v582_v25 = vpack.c.bf16 %v238_v19, %v237_v17  ;;  %v552_v26 = vpack.c.bf16 %v190_v24, %v189_v20  ;;  %v554_v36 = vpack.c.bf16 %v208_v33, %v207_v32  ;;  %v240_v37 = vld [vmem:[%s1063_s1 + $0x1c8] sm:$0xff]  ;;  %v191_v38 = vld [vmem:[%s1063_s1 + $0x40] sm:$0xff]  ;;  %v209_v48 = vld [vmem:[%s1063_s1 + $0xd0] sm:$0xff] }
  0x15   :  { %52 = vadd.xlane.f32.xlu0 %v51_v31  ;;  %545 = vmatpush3.bf16.msra.mxu0 %v544_v55  ;;  %v584_v31 = vpack.c.bf16 %v222_v30, %v221_v27  ;;  %v192_v40 = vld [vmem:[%s1063_s1 + $0x48] sm:$0xff]  ;;  %v586_v41 = vpack.c.bf16 %v240_v37, %v239_v35  ;;  %v223_v44 = vld [vmem:[%s1063_s1 + $0x140] sm:$0xff]  ;;  %v210_v51 = vld [vmem:[%s1063_s1 + $0xd8] sm:$0xff] }
  0x16   :  { %577 = vmatpush3.bf16.msra.mxu1 %v576_v56  ;;  %547 = vmatprep.subr.bf16.mxu0 %v546_v61  ;;  %v556_v43 = vpack.c.bf16 %v192_v40, %v191_v38  ;;  %v224_v46 = vld [vmem:[%s1063_s1 + $0x148] sm:$0xff]  ;;  %v241_v53 = vld [vmem:[%s1063_s1 + $0x1d0] sm:$0xff]  ;;  %v558_v54 = vpack.c.bf16 %v210_v51, %v209_v48  ;;  %v242_v55 = vld [vmem:[%s1063_s1 + $0x1d8] sm:$0xff] }
  0x17   :  { %579 = vmatprep.subr.bf16.mxu1 %v578_v7  ;;  %v588_v47 = vpack.c.bf16 %v224_v46, %v223_v44  ;;  %v193_v56 = vld [vmem:[%s1063_s1 + $0x50] sm:$0xff]  ;;  %v590_v50 = vpack.c.bf16 %v242_v55, %v241_v53  ;;  %v211_v62 = vld [vmem:[%s1063_s1 + $0xe0] sm:$0xff]  ;;  %v212_v63 = vld [vmem:[%s1063_s1 + $0xe8] sm:$0xff] }
  0x18   :  { %111 = vadd.xlane.f32.xlu1 %v110_v57  ;;  %v194_v57 = vld [vmem:[%s1063_s1 + $0x58] sm:$0xff]  ;;  %v225_v59 = vld [vmem:[%s1063_s1 + $0x150] sm:$0xff]  ;;  %v243_v4 = vld [vmem:[%s1063_s1 + $0x1e0] sm:$0xff]  ;;  %v562_v7 = vpack.c.bf16 %v212_v63, %v211_v62 }
  0x19   :  { %62 = vadd.xlane.f32.xlu0 %v61_v60  ;;  %549 = vmatpush3.bf16.msra.mxu0 %v548_v8  ;;  %v560_v58 = vpack.c.bf16 %v194_v57, %v193_v56  ;;  %v226_v60 = vld [vmem:[%s1063_s1 + $0x158] sm:$0xff]  ;;  %v244_v8 = vld [vmem:[%s1063_s1 + $0x1e8] sm:$0xff]  ;;  %v195_v9 = vld [vmem:[%s1063_s1 + $0x60] sm:$0xff] }
  0x1a   :  { %581 = vmatpush3.bf16.msra.mxu1 %v580_v13  ;;  %551 = vmatprep.subr.bf16.mxu0 %v550_v18  ;;  %v592_v61 = vpack.c.bf16 %v226_v60, %v225_v59  ;;  %v196_v12 = vld [vmem:[%s1063_s1 + $0x68] sm:$0xff]  ;;  %v594_v13 = vpack.c.bf16 %v244_v8, %v243_v4  ;;  %v227_v15 = vld [vmem:[%s1063_s1 + $0x160] sm:$0xff]  ;;  %v213_v19 = vld [vmem:[%s1063_s1 + $0xf0] sm:$0xff] }
  0x1b   :  { %583 = vmatprep.subr.bf16.mxu1 %v582_v25  ;;  %v564_v14 = vpack.c.bf16 %v196_v12, %v195_v9  ;;  %v228_v17 = vld [vmem:[%s1063_s1 + $0x168] sm:$0xff]  ;;  %v214_v20 = vld [vmem:[%s1063_s1 + $0xf8] sm:$0xff]  ;;  %v245_v24 = vld [vmem:[%s1063_s1 + $0x1f0] sm:$0xff] }
  0x1c   :  { %v596_v18 = vpack.c.bf16 %v228_v17, %v227_v15  ;;  %v566_v25 = vpack.c.bf16 %v214_v20, %v213_v19  ;;  %v197_v27 = vld [vmem:[%s1063_s1 + $0x70] sm:$0xff]  ;;  %v198_v30 = vld [vmem:[%s1063_s1 + $0x78] sm:$0xff] }
  0x1d   :  { %553 = vmatpush3.bf16.msra.mxu0 %v552_v26  ;;  %v246_v26 = vld [vmem:[%s1063_s1 + $0x1f8] sm:$0xff]  ;;  %v568_v32 = vpack.c.bf16 %v198_v30, %v197_v27  ;;  %v229_v33 = vld [vmem:[%s1063_s1 + $0x170] sm:$0xff] }
  0x1e   :  { %585 = vmatpush3.bf16.msra.mxu1 %v584_v31  ;;  %555 = vmatprep.subr.bf16.mxu0 %v554_v36  ;;  %v598_v31 = vpack.c.bf16 %v246_v26, %v245_v24  ;;  %v230_v35 = vld [vmem:[%s1063_s1 + $0x178] sm:$0xff] }
  0x1f   :  { %587 = vmatprep.subr.bf16.mxu1 %v586_v41  ;;  %v600_v36 = vpack.c.bf16 %v230_v35, %v229_v33 }
  0x21   :  { %557 = vmatpush3.bf16.msra.mxu0 %v556_v43 }
  0x22   :  { %589 = vmatpush3.bf16.msra.mxu1 %v588_v47  ;;  %559 = vmatprep.subr.bf16.mxu0 %v558_v54 }
  0x23   :  { %591 = vmatprep.subr.bf16.mxu1 %v590_v50 }
  0x25   :  { %561 = vmatpush3.bf16.msra.mxu0 %v560_v58 }
  0x26   :  { %593 = vmatpush3.bf16.msra.mxu1 %v592_v61  ;;  %563 = vmatprep.subr.bf16.mxu0 %v562_v7 }
  0x27   :  { %595 = vmatprep.subr.bf16.mxu1 %v594_v13 }
  0x29   :  { %565 = vmatpush3.bf16.msra.mxu0 %v564_v14 }
  0x2a   :  { %597 = vmatpush3.bf16.msra.mxu1 %v596_v18  ;;  %567 = vmatprep.subr.bf16.mxu0 %v566_v25 }
  0x2b   :  { %599 = vmatprep.subr.bf16.mxu1 %v598_v31 }
  0x2d   :  { %569 = vmatpush3.bf16.msra.mxu0 %v568_v32 }
  0x2e   :  { %601 = vmatpush3.bf16.msra.mxu1 %v600_v36 }
  0x95   :  { %v43_v37 = vpop.xlane.xlu1 %42 }
  0x96   :  { %v992_v38 = vmul.f32 0.001953125, %v43_v37  ;;  %v38_v40 = vpop.xlane.xlu0 %37 }
  0x97   :  { %v113_v41 = vmul.f32 0.001953125, %v38_v40 }
  0x98   :  { %v124_v43 = vmul.f32 %v992_v38, %v992_v38  ;;  %v138_v32 = vsub.f32 %v640_v1, %v992_v38  ;;  %v140_v33 = vsub.f32 %v650_v3, %v992_v38  ;;  %v139_v1 = vsub.f32 %v645_v2, %v992_v38 }
  0x99   :  { %v93_v44 = vpop.xlane.xlu1 %92  ;;  %v123_v48 = vmul.f32 %v113_v41, %v113_v41  ;;  %v134_v24 = vsub.f32 %v662_v6, %v113_v41  ;;  %v136_v25 = vsub.f32 %v678_v11, %v113_v41  ;;  %v133_v26 = vsub.f32 %v657_v5, %v113_v41 }
  0x9a   :  { %v119_v46 = vmul.f32 0.001953125, %v93_v44  ;;  %v88_v47 = vpop.xlane.xlu0 %87  ;;  %v135_v27 = vsub.f32 %v673_v10, %v113_v41  ;;  %v137_v10 = vsub.f32 %v635_v0, %v992_v38 }
  0x9b   :  { %v118_v51 = vmul.f32 0.001953125, %v88_v47 }
  0x9c   :  { %v129_v53 = vsub.f32 %v119_v46, %v124_v43 }
  0x9d   :  { %v128_v54 = vsub.f32 %v118_v51, %v123_v48  ;;  %v98_v55 = vpop.xlane.xlu1 %97 }
  0x9e   :  { %v154_v56 = vadd.f32 1e-05, %v129_v53  ;;  %v48_v57 = vpop.xlane.xlu0 %47  ;;  %v120_v59 = vmul.f32 0.001953125, %v98_v55 }
  0x9f   :  { %v153_v50 = vadd.f32 1e-05, %v128_v54  ;;  %v996_v58 = vmul.f32 0.001953125, %v48_v57 }
  0xa0   :  { %602 = vrsqrt.f32 %v154_v56 }
  0xa1   :  { %604 = vrsqrt.f32 %v153_v50  ;;  %v125_v60 = vmul.f32 %v996_v58, %v996_v58  ;;  %v103_v61 = vpop.xlane.xlu1 %102  ;;  %v142_v3 = vsub.f32 %v701_v21, %v996_v58  ;;  %v144_v41 = vsub.f32 %v711_v23, %v996_v58 }
  0xa2   :  { %v53_v62 = vpop.xlane.xlu0 %52  ;;  %v121_v7 = vmul.f32 0.001953125, %v103_v61  ;;  %v141_v0 = vsub.f32 %v691_v16, %v996_v58  ;;  %v143_v2 = vsub.f32 %v706_v22, %v996_v58 }
  0xa3   :  { %v130_v63 = vsub.f32 %v120_v59, %v125_v60  ;;  %v1000_v4 = vmul.f32 0.001953125, %v53_v62  ;;  %v443_v62 = vld [vmem:[%s1064_s2] ss:$0 sm:$0xff] }
  0xa5   :  { %v155_v8 = vadd.f32 1e-05, %v130_v63  ;;  %v126_v9 = vmul.f32 %v1000_v4, %v1000_v4  ;;  %v112_v12 = vpop.xlane.xlu1 %111  ;;  %v146_v21 = vsub.f32 %v726_v29, %v1000_v4  ;;  %v148_v23 = vsub.f32 %v750_v42, %v1000_v4 }
  0xa6   :  { %v63_v13 = vpop.xlane.xlu0 %62  ;;  %v122_v17 = vmul.f32 0.001953125, %v112_v12  ;;  %v145_v16 = vsub.f32 %v721_v28, %v1000_v4  ;;  %v147_v22 = vsub.f32 %v736_v34, %v1000_v4 }
  0xa7   :  { %606 = vrsqrt.f32 %v155_v8  ;;  %v131_v14 = vsub.f32 %v121_v7, %v126_v9  ;;  %v1004_v15 = vmul.f32 0.001953125, %v63_v13 }
  0xa9   :  { %v156_v18 = vadd.f32 1e-05, %v131_v14  ;;  %v127_v19 = vmul.f32 %v1004_v15, %v1004_v15  ;;  %v150_v29 = vsub.f32 %v759_v45, %v1004_v15  ;;  %v152_v42 = vsub.f32 %v774_v52, %v1004_v15 }
  0xaa   :  { %v603_v20 = vpop.eup %602  ;;  %v149_v28 = vsub.f32 %v745_v39, %v1004_v15  ;;  %v151_v34 = vsub.f32 %v768_v49, %v1004_v15 }
  0xab   :  { %v605_v30 = vpop.eup %604  ;;  %608 = vrsqrt.f32 %v156_v18  ;;  %v132_v31 = vsub.f32 %v122_v17, %v127_v19  ;;  %v168_v11 = vmul.f32 %v603_v20, %v138_v32  ;;  %v170_v5 = vmul.f32 %v603_v20, %v140_v33 }
  0xac   :  { %v164_v35 = vmul.f32 %v605_v30, %v134_v24  ;;  %v166_v36 = vmul.f32 %v605_v30, %v136_v25  ;;  %v163_v37 = vmul.f32 %v605_v30, %v133_v26  ;;  %v165_v40 = vmul.f32 %v605_v30, %v135_v27 }
  0xad   :  { %v157_v6 = vadd.f32 1e-05, %v132_v31  ;;  %v167_v44 = vmul.f32 %v603_v20, %v137_v10  ;;  %v169_v46 = vmul.f32 %v603_v20, %v139_v1 }
  0xae   :  { %318 = vmatprep.mubr.f32.mxu0 %v164_v35  ;;  %408 = vmatprep.mubr.f32.mxu1 %v166_v36 }
  0xaf   :  { %610 = vrsqrt.f32 %v157_v6  ;;  %319 = vmatmul.mubr.f32.vlgmr.msra.gmra.mrb[0].mxu0 %v163_v37  ;;  %409 = vmatmul.mubr.f32.vlgmr.msra.gmra.mrb[0].mxu1 %v165_v40 }
  0xb0   :  { %323 = vmatprep.mubr.f32.mxu0 %v168_v11  ;;  %413 = vmatprep.mubr.f32.mxu1 %v170_v5 }
  0xb1   :  { %v607_v43 = vpop.eup %606 }
  0xb2   :  { %v172_v47 = vmul.f32 %v607_v43, %v142_v3  ;;  %v174_v48 = vmul.f32 %v607_v43, %v144_v41  ;;  %v171_v51 = vmul.f32 %v607_v43, %v141_v0  ;;  %v173_v53 = vmul.f32 %v607_v43, %v143_v2 }
  0xb3   :  { %324 = vmatmul.mubr.f32.gmra.mrb[2].mxu0 %v167_v44  ;;  %414 = vmatmul.mubr.f32.gmra.mrb[2].mxu1 %v169_v46 }
  0xb4   :  { %328 = vmatprep.mubr.f32.mxu0 %v172_v47  ;;  %418 = vmatprep.mubr.f32.mxu1 %v174_v48 }
  0xb5   :  { %v609_v38 = vpop.eup %608 }
  0xb6   :  { %v176_v54 = vmul.f32 %v609_v38, %v146_v21  ;;  %v178_v55 = vmul.f32 %v609_v38, %v148_v23  ;;  %v175_v57 = vmul.f32 %v609_v38, %v145_v16  ;;  %v177_v50 = vmul.f32 %v609_v38, %v147_v22 }
  0xb7   :  { %329 = vmatmul.mubr.f32.gmra.mrb[4].mxu0 %v171_v51  ;;  %419 = vmatmul.mubr.f32.gmra.mrb[4].mxu1 %v173_v53 }
  0xb8   :  { %333 = vmatprep.mubr.f32.mxu0 %v176_v54  ;;  %423 = vmatprep.mubr.f32.mxu1 %v178_v55 }
  0xb9   :  { %v611_v56 = vpop.eup %610 }
  0xba   :  { %v180_v58 = vmul.f32 %v611_v56, %v150_v29  ;;  %v182_v59 = vmul.f32 %v611_v56, %v152_v42  ;;  %v179_v60 = vmul.f32 %v611_v56, %v149_v28  ;;  %v181_v45 = vmul.f32 %v611_v56, %v151_v34 }
  0xbb   :  { %334 = vmatmul.mubr.f32.gmra.mrb[6].mxu0 %v175_v57  ;;  %424 = vmatmul.mubr.f32.gmra.mrb[6].mxu1 %v177_v50 }
  0xbc   :  { %338 = vmatprep.mubr.f32.mxu0 %v180_v58  ;;  %428 = vmatprep.mubr.f32.mxu1 %v182_v59 }
  0xbf   :  { %339 = vmatmul.mubr.f32.gmra.mrb[8].mxu0 %v179_v60  ;;  %429 = vmatmul.mubr.f32.gmra.mrb[8].mxu1 %v181_v45 }
 0x182   :  { %v476_v52 = vpop.f32.mrb[0].mxu0  ;;  %v523_v61 = vpop.f32.mrb[0].mxu1 }
 0x183   :  { %v477_v63 = vpop.f32.mrb[1].mxu0  ;;  %v524_v4 = vpop.f32.mrb[1].mxu1 }
 0x184   :  { %v478_v7 = vadd.f32 %v477_v63, %v476_v52  ;;  %v525_v8 = vadd.f32 %v524_v4, %v523_v61 }
 0x186   :  { %v321_v39 = vadd.f32 %v478_v7, %v443_v62  ;;  %v479_v9 = vpop.f32.mrb[2].mxu0  ;;  %v526_v12 = vpop.f32.mrb[2].mxu1 }
 0x187   :  { %v480_v49 = vpop.f32.mrb[3].mxu0  ;;  %v527_v13 = vpop.f32.mrb[3].mxu1 }
 0x188   :  { %v411_v14 = vadd.f32 %v525_v8, %v321_v39  ;;  %v481_v15 = vadd.f32 %v480_v49, %v479_v9  ;;  %v528_v17 = vadd.f32 %v527_v13, %v526_v12 }
 0x18a   :  { %434 = vst [vmem:[%s1065_s3] sm:$0xff] %v411_v14  ;;  %v326_v18 = vadd.f32 %v481_v15, %v443_v62  ;;  %v482_v19 = vpop.f32.mrb[4].mxu0  ;;  %v529_v20 = vpop.f32.mrb[4].mxu1 }
 0x18b   :  { %v483_v24 = vpop.f32.mrb[5].mxu0  ;;  %v530_v25 = vpop.f32.mrb[5].mxu1 }
 0x18c   :  { %v416_v26 = vadd.f32 %v528_v17, %v326_v18  ;;  %v484_v27 = vadd.f32 %v483_v24, %v482_v19  ;;  %v531_v30 = vadd.f32 %v530_v25, %v529_v20 }
 0x18e   :  { %435 = vst [vmem:[%s1065_s3 + $0x8] sm:$0xff] %v416_v26  ;;  %v331_v31 = vadd.f32 %v484_v27, %v443_v62  ;;  %v485_v32 = vpop.f32.mrb[6].mxu0  ;;  %v532_v33 = vpop.f32.mrb[6].mxu1 }
 0x18f   :  { %v486_v35 = vpop.f32.mrb[7].mxu0  ;;  %v533_v36 = vpop.f32.mrb[7].mxu1 }
 0x190   :  { %v421_v37 = vadd.f32 %v531_v30, %v331_v31  ;;  %v487_v40 = vadd.f32 %v486_v35, %v485_v32  ;;  %v534_v6 = vadd.f32 %v533_v36, %v532_v33 }
 0x192   :  { %436 = vst [vmem:[%s1065_s3 + $0x10] sm:$0xff] %v421_v37  ;;  %v336_v11 = vadd.f32 %v487_v40, %v443_v62  ;;  %v488_v5 = vpop.f32.mrb[8].mxu0  ;;  %v535_v10 = vpop.f32.mrb[8].mxu1 }
 0x193   :  { %v489_v1 = vpop.f32.mrb[9].mxu0  ;;  %v536_v3 = vpop.f32.mrb[9].mxu1 }
 0x194   :  { %v426_v41 = vadd.f32 %v534_v6, %v336_v11  ;;  %v490_v43 = vadd.f32 %v489_v1, %v488_v5  ;;  %v537_v44 = vadd.f32 %v536_v3, %v535_v10 }
 0x196   :  { %437 = vst [vmem:[%s1065_s3 + $0x18] sm:$0xff] %v426_v41  ;;  %v341_v46 = vadd.f32 %v490_v43, %v443_v62 }
 0x198   :  { %v431_v47 = vadd.f32 %v537_v44, %v341_v46 }
 0x19a   :  { %438 = vst [vmem:[%s1065_s3 + $0x20] sm:$0xf] %v431_v47 }

</bundles_post_ra>
